<compile_context>
chip_gen: v7x
topology: tpu7x:2x2x1
jax: 0.10.0
libtpu: 0.0.40
codegen_flags: <defaults>
</compile_context>

<pallas_src>
import jax
import jax.numpy as jnp
from jax import lax
from jax.experimental import pallas as pl
from jax.experimental.pallas import tpu as pltpu

INPUT_SIZE = 4
HIDDEN_SIZE = 10
OUTPUT_SIZE = 4


def _lstm_kernel(x_ref, wih_ref, whh_ref, b_ref, wlin_ref, blin_ref,
                 y_ref, cn_ref):
    """Fused single-layer LSTM + output Linear.

    Gate order is PyTorch's [i, f, g, o]; the g-gate columns of wih/whh/b are
    pre-scaled by 2 so tanh(z) = 2*sigmoid(2z) - 1 needs no in-kernel rescale
    of the pre-activation.

    x_ref   : (T, Bp, D)   time-major, batch padded to a multiple of 8
    wih_ref : (D, 4H)      W_ih^T (g rows pre-scaled by 2)
    whh_ref : (H, 4H)      W_hh^T (g rows pre-scaled by 2)
    b_ref   : (1, 4H)      b_ih + b_hh (g slice pre-scaled by 2)
    wlin_ref: (H, O)       W_linear^T
    blin_ref: (1, O)       b_linear
    y_ref   : (Bp, T, O)   linear(lstm_out), batch-major (no wrapper transpose)
    cn_ref  : (Bp, H)      final cell state
    """
    T, Bp, D = x_ref.shape
    H = whh_ref.shape[0]
    O = wlin_ref.shape[1]

    whh = whh_ref[...]

    # (1) Hoisted input projection + fused bias: one big MXU op.
    x_flat = x_ref[...].reshape(T * Bp, D)
    x_proj = (jnp.dot(x_flat, wih_ref[...], preferred_element_type=jnp.float32)
              + b_ref[...])                                   # (T*Bp, 4H)

    h = jnp.zeros((Bp, H), jnp.float32)
    c = jnp.zeros((Bp, H), jnp.float32)
    hs = []

    # (2) Fully unrolled recurrence (T is a static trace-time constant), so
    #     every slice offset below is static and the scheduler sees all steps.
    for t in range(T):
        gates = (x_proj[t * Bp:(t + 1) * Bp, :]
                 + jnp.dot(h, whh, preferred_element_type=jnp.float32))
        s = jax.nn.sigmoid(gates)                              # one EUP pass, all 4H
        i_g = s[:, 0 * H:1 * H]
        f_g = s[:, 1 * H:2 * H]
        g_g = 2.0 * s[:, 2 * H:3 * H] - 1.0                    # tanh via sigmoid identity
        o_g = s[:, 3 * H:4 * H]
        c = f_g * c + i_g * g_g
        h = o_g * jnp.tanh(c)
        hs.append(h)

    cn_ref[...] = c

    # (3) Deferred output projection: one (T*Bp, H) @ (H, O) matmul and a
    #     single batch-major store.
    h_all = jnp.concatenate(hs, axis=0)                        # (T*Bp, H)
    y = (jnp.dot(h_all, wlin_ref[...], preferred_element_type=jnp.float32)
         + blin_ref[...]).reshape(T, Bp, O)
    y_ref[...] = jnp.transpose(y, (1, 0, 2))                   # (Bp, T, O)


def trajectory_lstm_forward(x, params):
    """x: (B, T, D) batch-first.  Returns (final_output (B,T,O), c_n (1,B,H))."""
    W_ih, W_hh, b_ih, b_hh, W_lin, b_lin = params
    B, T, D = x.shape
    H = W_hh.shape[1]
    O = W_lin.shape[0]
    Bp = ((B + 7) // 8) * 8                                    # pad batch to 8 sublanes

    # Fold the 2x scale needed by the tanh-as-sigmoid identity into the g-gate
    # rows (PyTorch order [i, f, g, o] -> rows 2H:3H) of the weights/bias.
    g_scale = jnp.concatenate([jnp.ones((2 * H,), jnp.float32),
                               jnp.full((H,), 2.0, jnp.float32),
                               jnp.ones((H,), jnp.float32)])
    wih_t = (W_ih.astype(jnp.float32) * g_scale[:, None]).T    # (D, 4H)
    whh_t = (W_hh.astype(jnp.float32) * g_scale[:, None]).T    # (H, 4H)
    b = ((b_ih + b_hh).astype(jnp.float32) * g_scale).reshape(1, 4 * H)
    wlin_t = W_lin.T.astype(jnp.float32)                       # (H, O)
    blin = b_lin.reshape(1, O).astype(jnp.float32)             # (1, O)

    x_tm = jnp.transpose(x, (1, 0, 2)).astype(jnp.float32)     # (T, B, D)
    x_p = jnp.pad(x_tm, ((0, 0), (0, Bp - B), (0, 0)))         # (T, Bp, D)

    cost = pl.CostEstimate(
        flops=int(2 * T * Bp * (D + H) * 4 * H + 2 * T * Bp * H * O),
        transcendentals=int(T * Bp * 5 * H),
        bytes_accessed=int(4 * (T * Bp * (D + O) + Bp * H
                                + (D + H) * 4 * H + 4 * H + H * O + O)),
    )

    vmem = pl.BlockSpec(memory_space=pltpu.MemorySpace.VMEM)
    # TODO(synk): for production-sized B, add a leading grid axis over batch
    # chunks with dimension_semantics=("parallel",) to use both v7x TensorCores,
    # and tile the time axis if (T, Bp) arrays approach the v7x VMEM limit.
    y_p, c_p = pl.pallas_call(
        _lstm_kernel,
        out_shape=(jax.ShapeDtypeStruct((Bp, T, O), jnp.float32),
                   jax.ShapeDtypeStruct((Bp, H), jnp.float32)),
        in_specs=[vmem] * 6,
        out_specs=(vmem, vmem),
        cost_estimate=cost,
    )(x_p, wih_t, whh_t, b, wlin_t, blin)

    final_output = y_p[:B]                                     # (B, T, O)
    c_n_out = c_p[:B].reshape(1, B, H)                         # (num_layers, B, H)
    return final_output, c_n_out


def _reference_forward(x, params):
    """Pure-JAX reference matching PyTorch nn.LSTM + nn.Linear semantics."""
    W_ih, W_hh, b_ih, b_hh, W_lin, b_lin = params
    B, T, D = x.shape
    H = W_hh.shape[1]

    def step(carry, x_t):
        h, c = carry
        gates = x_t @ W_ih.T + b_ih + h @ W_hh.T + b_hh
        i_g = jax.nn.sigmoid(gates[:, 0 * H:1 * H])
        f_g = jax.nn.sigmoid(gates[:, 1 * H:2 * H])
        g_g = jnp.tanh(gates[:, 2 * H:3 * H])
        o_g = jax.nn.sigmoid(gates[:, 3 * H:4 * H])
        c_new = f_g * c + i_g * g_g
        h_new = o_g * jnp.tanh(c_new)
        return (h_new, c_new), h_new

    h0 = jnp.zeros((B, H), jnp.float32)
    c0 = jnp.zeros((B, H), jnp.float32)
    (h_f, c_f), hs = lax.scan(step, (h0, c0), jnp.transpose(x, (1, 0, 2)))
    lstm_out = jnp.transpose(hs, (1, 0, 2))                    # (B, T, H)
    final_output = lstm_out @ W_lin.T + b_lin
    return final_output, c_f.reshape(1, B, H)


def _init_params(key, input_size, hidden_size, output_size):
    """Deterministic init mirroring PyTorch's U(-1/sqrt(H), 1/sqrt(H))."""
    ks = jax.random.split(key, 6)
    s = 1.0 / jnp.sqrt(jnp.float32(hidden_size))
    u = lambda k, shape: jax.random.uniform(k, shape, jnp.float32, -s, s)
    W_ih = u(ks[0], (4 * hidden_size, input_size))
    W_hh = u(ks[1], (4 * hidden_size, hidden_size))
    b_ih = u(ks[2], (4 * hidden_size,))
    b_hh = u(ks[3], (4 * hidden_size,))
    W_lin = u(ks[4], (output_size, hidden_size))
    b_lin = u(ks[5], (output_size,))
    # TODO(synk): linear_param (hidden->2) belongs to get_embedding(), which is
    # not part of forward(); it is intentionally not implemented in the kernel.
    return (W_ih, W_hh, b_ih, b_hh, W_lin, b_lin)


if __name__ == "__main__":
    key = jax.random.PRNGKey(0)
    k_param, k_x = jax.random.split(key)

    B, T = 2, 8
    params = _init_params(k_param, INPUT_SIZE, HIDDEN_SIZE, OUTPUT_SIZE)
    x = jax.random.normal(k_x, (B, T, INPUT_SIZE), jnp.float32)

    fwd = jax.jit(trajectory_lstm_forward)
    out, c_n = fwd(x, params)
    out = jax.block_until_ready(out)
    c_n = jax.block_until_ready(c_n)

    ref_out, ref_c_n = _reference_forward(x, params)
    assert out.shape == (B, T, OUTPUT_SIZE)
    assert c_n.shape == (1, B, HIDDEN_SIZE)
    # tanh(z) = 2*sigmoid(2z) - 1 is exact mathematically; float32 deviation is
    # ~1e-6 through the 8-step recurrence, well inside these tolerances.
    assert jnp.allclose(out, ref_out, atol=1e-5, rtol=1e-5)
    assert jnp.allclose(c_n, ref_c_n, atol=1e-5, rtol=1e-5)

    print("KERNEL_OK")
</pallas_src>

<mosaic_0001>
module attributes {stable_mosaic.version = 11 : i64} {
  func.func @_lstm_kernel(%arg0: memref<8x8x4xf32, #tpu.memory_space<vmem>>, %arg1: memref<4x40xf32, #tpu.memory_space<vmem>>, %arg2: memref<10x40xf32, #tpu.memory_space<vmem>>, %arg3: memref<1x40xf32, #tpu.memory_space<vmem>>, %arg4: memref<10x4xf32, #tpu.memory_space<vmem>>, %arg5: memref<1x4xf32, #tpu.memory_space<vmem>>, %arg6: memref<8x8x4xf32, #tpu.memory_space<vmem>>, %arg7: memref<8x10xf32, #tpu.memory_space<vmem>>) attributes {dimension_semantics = [], scalar_prefetch = 0 : i64, scratch_operands = 0 : i64, tpu.core_type = #tpu.core_type<tc>} {
    %c0 = arith.constant 0 : index
    %c0_0 = arith.constant 0 : index
    %0 = vector.load %arg2[%c0, %c0_0] : memref<10x40xf32, #tpu.memory_space<vmem>>, vector<10x40xf32>
    %c0_1 = arith.constant 0 : index
    %c0_2 = arith.constant 0 : index
    %c0_3 = arith.constant 0 : index
    %1 = vector.load %arg0[%c0_1, %c0_2, %c0_3] : memref<8x8x4xf32, #tpu.memory_space<vmem>>, vector<8x8x4xf32>
    %2 = vector.shape_cast %1 : vector<8x8x4xf32> to vector<64x4xf32>
    %c0_4 = arith.constant 0 : index
    %c0_5 = arith.constant 0 : index
    %3 = vector.load %arg1[%c0_4, %c0_5] : memref<4x40xf32, #tpu.memory_space<vmem>>, vector<4x40xf32>
    %cst = arith.constant dense<0.000000e+00> : vector<64x40xf32>
    %4 = tpu.matmul %2, %3, %cst {dimension_numbers = #tpu.dot_dimension_numbers<[1], [0], [0], [1], [0, 0, 1, 1], [], []>} : vector<64x4xf32>, vector<4x40xf32>, vector<64x40xf32> -> vector<64x40xf32>
    %c0_6 = arith.constant 0 : index
    %c0_7 = arith.constant 0 : index
    %5 = vector.load %arg3[%c0_6, %c0_7] : memref<1x40xf32, #tpu.memory_space<vmem>>, vector<1x40xf32>
    %6 = vector.broadcast %5 : vector<1x40xf32> to vector<64x40xf32>
    %7 = arith.addf %4, %6 : vector<64x40xf32>
    %cst_8 = arith.constant 0.000000e+00 : f32
    %8 = vector.broadcast %cst_8 : f32 to vector<8x10xf32>
    %cst_9 = arith.constant 0.000000e+00 : f32
    %9 = vector.broadcast %cst_9 : f32 to vector<8x10xf32>
    %10 = vector.extract_strided_slice %7 {offsets = [0, 0], sizes = [8, 40], strides = [1, 1]} : vector<64x40xf32> to vector<8x40xf32>
    %cst_10 = arith.constant dense<0.000000e+00> : vector<8x40xf32>
    %11 = tpu.matmul %8, %0, %cst_10 {dimension_numbers = #tpu.dot_dimension_numbers<[1], [0], [0], [1], [0, 0, 1, 1], [], []>} : vector<8x10xf32>, vector<10x40xf32>, vector<8x40xf32> -> vector<8x40xf32>
    %12 = arith.addf %10, %11 : vector<8x40xf32>
    %13 = arith.negf %12 : vector<8x40xf32>
    %14 = math.exp %13 : vector<8x40xf32>
    %cst_11 = arith.constant 1.000000e+00 : f32
    %15 = vector.broadcast %cst_11 : f32 to vector<8x40xf32>
    %16 = arith.addf %15, %14 : vector<8x40xf32>
    %17 = arith.divf %15, %16 : vector<8x40xf32>
    %18 = vector.extract_strided_slice %17 {offsets = [0, 0], sizes = [8, 10], strides = [1, 1]} : vector<8x40xf32> to vector<8x10xf32>
    %19 = vector.extract_strided_slice %17 {offsets = [0, 10], sizes = [8, 10], strides = [1, 1]} : vector<8x40xf32> to vector<8x10xf32>
    %20 = vector.extract_strided_slice %17 {offsets = [0, 20], sizes = [8, 10], strides = [1, 1]} : vector<8x40xf32> to vector<8x10xf32>
    %cst_12 = arith.constant 2.000000e+00 : f32
    %21 = vector.broadcast %cst_12 : f32 to vector<8x10xf32>
    %22 = arith.mulf %21, %20 : vector<8x10xf32>
    %cst_13 = arith.constant 1.000000e+00 : f32
    %23 = vector.broadcast %cst_13 : f32 to vector<8x10xf32>
    %24 = arith.subf %22, %23 : vector<8x10xf32>
    %25 = vector.extract_strided_slice %17 {offsets = [0, 30], sizes = [8, 10], strides = [1, 1]} : vector<8x40xf32> to vector<8x10xf32>
    %26 = arith.mulf %19, %9 : vector<8x10xf32>
    %27 = arith.mulf %18, %24 : vector<8x10xf32>
    %28 = arith.addf %26, %27 : vector<8x10xf32>
    %29 = math.tanh %28 : vector<8x10xf32>
    %30 = arith.mulf %25, %29 : vector<8x10xf32>
    %31 = vector.extract_strided_slice %7 {offsets = [8, 0], sizes = [8, 40], strides = [1, 1]} : vector<64x40xf32> to vector<8x40xf32>
    %cst_14 = arith.constant dense<0.000000e+00> : vector<8x40xf32>
    %32 = tpu.matmul %30, %0, %cst_14 {dimension_numbers = #tpu.dot_dimension_numbers<[1], [0], [0], [1], [0, 0, 1, 1], [], []>} : vector<8x10xf32>, vector<10x40xf32>, vector<8x40xf32> -> vector<8x40xf32>
    %33 = arith.addf %31, %32 : vector<8x40xf32>
    %34 = arith.negf %33 : vector<8x40xf32>
    %35 = math.exp %34 : vector<8x40xf32>
    %cst_15 = arith.constant 1.000000e+00 : f32
    %36 = vector.broadcast %cst_15 : f32 to vector<8x40xf32>
    %37 = arith.addf %36, %35 : vector<8x40xf32>
    %38 = arith.divf %36, %37 : vector<8x40xf32>
    %39 = vector.extract_strided_slice %38 {offsets = [0, 0], sizes = [8, 10], strides = [1, 1]} : vector<8x40xf32> to vector<8x10xf32>
    %40 = vector.extract_strided_slice %38 {offsets = [0, 10], sizes = [8, 10], strides = [1, 1]} : vector<8x40xf32> to vector<8x10xf32>
    %41 = vector.extract_strided_slice %38 {offsets = [0, 20], sizes = [8, 10], strides = [1, 1]} : vector<8x40xf32> to vector<8x10xf32>
    %cst_16 = arith.constant 2.000000e+00 : f32
    %42 = vector.broadcast %cst_16 : f32 to vector<8x10xf32>
    %43 = arith.mulf %42, %41 : vector<8x10xf32>
    %cst_17 = arith.constant 1.000000e+00 : f32
    %44 = vector.broadcast %cst_17 : f32 to vector<8x10xf32>
    %45 = arith.subf %43, %44 : vector<8x10xf32>
    %46 = vector.extract_strided_slice %38 {offsets = [0, 30], sizes = [8, 10], strides = [1, 1]} : vector<8x40xf32> to vector<8x10xf32>
    %47 = arith.mulf %40, %28 : vector<8x10xf32>
    %48 = arith.mulf %39, %45 : vector<8x10xf32>
    %49 = arith.addf %47, %48 : vector<8x10xf32>
    %50 = math.tanh %49 : vector<8x10xf32>
    %51 = arith.mulf %46, %50 : vector<8x10xf32>
    %52 = vector.extract_strided_slice %7 {offsets = [16, 0], sizes = [8, 40], strides = [1, 1]} : vector<64x40xf32> to vector<8x40xf32>
    %cst_18 = arith.constant dense<0.000000e+00> : vector<8x40xf32>
    %53 = tpu.matmul %51, %0, %cst_18 {dimension_numbers = #tpu.dot_dimension_numbers<[1], [0], [0], [1], [0, 0, 1, 1], [], []>} : vector<8x10xf32>, vector<10x40xf32>, vector<8x40xf32> -> vector<8x40xf32>
    %54 = arith.addf %52, %53 : vector<8x40xf32>
    %55 = arith.negf %54 : vector<8x40xf32>
    %56 = math.exp %55 : vector<8x40xf32>
    %cst_19 = arith.constant 1.000000e+00 : f32
    %57 = vector.broadcast %cst_19 : f32 to vector<8x40xf32>
    %58 = arith.addf %57, %56 : vector<8x40xf32>
    %59 = arith.divf %57, %58 : vector<8x40xf32>
    %60 = vector.extract_strided_slice %59 {offsets = [0, 0], sizes = [8, 10], strides = [1, 1]} : vector<8x40xf32> to vector<8x10xf32>
    %61 = vector.extract_strided_slice %59 {offsets = [0, 10], sizes = [8, 10], strides = [1, 1]} : vector<8x40xf32> to vector<8x10xf32>
    %62 = vector.extract_strided_slice %59 {offsets = [0, 20], sizes = [8, 10], strides = [1, 1]} : vector<8x40xf32> to vector<8x10xf32>
    %cst_20 = arith.constant 2.000000e+00 : f32
    %63 = vector.broadcast %cst_20 : f32 to vector<8x10xf32>
    %64 = arith.mulf %63, %62 : vector<8x10xf32>
    %cst_21 = arith.constant 1.000000e+00 : f32
    %65 = vector.broadcast %cst_21 : f32 to vector<8x10xf32>
    %66 = arith.subf %64, %65 : vector<8x10xf32>
    %67 = vector.extract_strided_slice %59 {offsets = [0, 30], sizes = [8, 10], strides = [1, 1]} : vector<8x40xf32> to vector<8x10xf32>
    %68 = arith.mulf %61, %49 : vector<8x10xf32>
    %69 = arith.mulf %60, %66 : vector<8x10xf32>
    %70 = arith.addf %68, %69 : vector<8x10xf32>
    %71 = math.tanh %70 : vector<8x10xf32>
    %72 = arith.mulf %67, %71 : vector<8x10xf32>
    %73 = vector.extract_strided_slice %7 {offsets = [24, 0], sizes = [8, 40], strides = [1, 1]} : vector<64x40xf32> to vector<8x40xf32>
    %cst_22 = arith.constant dense<0.000000e+00> : vector<8x40xf32>
    %74 = tpu.matmul %72, %0, %cst_22 {dimension_numbers = #tpu.dot_dimension_numbers<[1], [0], [0], [1], [0, 0, 1, 1], [], []>} : vector<8x10xf32>, vector<10x40xf32>, vector<8x40xf32> -> vector<8x40xf32>
    %75 = arith.addf %73, %74 : vector<8x40xf32>
    %76 = arith.negf %75 : vector<8x40xf32>
    %77 = math.exp %76 : vector<8x40xf32>
    %cst_23 = arith.constant 1.000000e+00 : f32
    %78 = vector.broadcast %cst_23 : f32 to vector<8x40xf32>
    %79 = arith.addf %78, %77 : vector<8x40xf32>
    %80 = arith.divf %78, %79 : vector<8x40xf32>
    %81 = vector.extract_strided_slice %80 {offsets = [0, 0], sizes = [8, 10], strides = [1, 1]} : vector<8x40xf32> to vector<8x10xf32>
    %82 = vector.extract_strided_slice %80 {offsets = [0, 10], sizes = [8, 10], strides = [1, 1]} : vector<8x40xf32> to vector<8x10xf32>
    %83 = vector.extract_strided_slice %80 {offsets = [0, 20], sizes = [8, 10], strides = [1, 1]} : vector<8x40xf32> to vector<8x10xf32>
    %cst_24 = arith.constant 2.000000e+00 : f32
    %84 = vector.broadcast %cst_24 : f32 to vector<8x10xf32>
    %85 = arith.mulf %84, %83 : vector<8x10xf32>
    %cst_25 = arith.constant 1.000000e+00 : f32
    %86 = vector.broadcast %cst_25 : f32 to vector<8x10xf32>
    %87 = arith.subf %85, %86 : vector<8x10xf32>
    %88 = vector.extract_strided_slice %80 {offsets = [0, 30], sizes = [8, 10], strides = [1, 1]} : vector<8x40xf32> to vector<8x10xf32>
    %89 = arith.mulf %82, %70 : vector<8x10xf32>
    %90 = arith.mulf %81, %87 : vector<8x10xf32>
    %91 = arith.addf %89, %90 : vector<8x10xf32>
    %92 = math.tanh %91 : vector<8x10xf32>
    %93 = arith.mulf %88, %92 : vector<8x10xf32>
    %94 = vector.extract_strided_slice %7 {offsets = [32, 0], sizes = [8, 40], strides = [1, 1]} : vector<64x40xf32> to vector<8x40xf32>
    %cst_26 = arith.constant dense<0.000000e+00> : vector<8x40xf32>
    %95 = tpu.matmul %93, %0, %cst_26 {dimension_numbers = #tpu.dot_dimension_numbers<[1], [0], [0], [1], [0, 0, 1, 1], [], []>} : vector<8x10xf32>, vector<10x40xf32>, vector<8x40xf32> -> vector<8x40xf32>
    %96 = arith.addf %94, %95 : vector<8x40xf32>
    %97 = arith.negf %96 : vector<8x40xf32>
    %98 = math.exp %97 : vector<8x40xf32>
    %cst_27 = arith.constant 1.000000e+00 : f32
    %99 = vector.broadcast %cst_27 : f32 to vector<8x40xf32>
    %100 = arith.addf %99, %98 : vector<8x40xf32>
    %101 = arith.divf %99, %100 : vector<8x40xf32>
    %102 = vector.extract_strided_slice %101 {offsets = [0, 0], sizes = [8, 10], strides = [1, 1]} : vector<8x40xf32> to vector<8x10xf32>
    %103 = vector.extract_strided_slice %101 {offsets = [0, 10], sizes = [8, 10], strides = [1, 1]} : vector<8x40xf32> to vector<8x10xf32>
    %104 = vector.extract_strided_slice %101 {offsets = [0, 20], sizes = [8, 10], strides = [1, 1]} : vector<8x40xf32> to vector<8x10xf32>
    %cst_28 = arith.constant 2.000000e+00 : f32
    %105 = vector.broadcast %cst_28 : f32 to vector<8x10xf32>
    %106 = arith.mulf %105, %104 : vector<8x10xf32>
    %cst_29 = arith.constant 1.000000e+00 : f32
    %107 = vector.broadcast %cst_29 : f32 to vector<8x10xf32>
    %108 = arith.subf %106, %107 : vector<8x10xf32>
    %109 = vector.extract_strided_slice %101 {offsets = [0, 30], sizes = [8, 10], strides = [1, 1]} : vector<8x40xf32> to vector<8x10xf32>
    %110 = arith.mulf %103, %91 : vector<8x10xf32>
    %111 = arith.mulf %102, %108 : vector<8x10xf32>
    %112 = arith.addf %110, %111 : vector<8x10xf32>
    %113 = math.tanh %112 : vector<8x10xf32>
    %114 = arith.mulf %109, %113 : vector<8x10xf32>
    %115 = vector.extract_strided_slice %7 {offsets = [40, 0], sizes = [8, 40], strides = [1, 1]} : vector<64x40xf32> to vector<8x40xf32>
    %cst_30 = arith.constant dense<0.000000e+00> : vector<8x40xf32>
    %116 = tpu.matmul %114, %0, %cst_30 {dimension_numbers = #tpu.dot_dimension_numbers<[1], [0], [0], [1], [0, 0, 1, 1], [], []>} : vector<8x10xf32>, vector<10x40xf32>, vector<8x40xf32> -> vector<8x40xf32>
    %117 = arith.addf %115, %116 : vector<8x40xf32>
    %118 = arith.negf %117 : vector<8x40xf32>
    %119 = math.exp %118 : vector<8x40xf32>
    %cst_31 = arith.constant 1.000000e+00 : f32
    %120 = vector.broadcast %cst_31 : f32 to vector<8x40xf32>
    %121 = arith.addf %120, %119 : vector<8x40xf32>
    %122 = arith.divf %120, %121 : vector<8x40xf32>
    %123 = vector.extract_strided_slice %122 {offsets = [0, 0], sizes = [8, 10], strides = [1, 1]} : vector<8x40xf32> to vector<8x10xf32>
    %124 = vector.extract_strided_slice %122 {offsets = [0, 10], sizes = [8, 10], strides = [1, 1]} : vector<8x40xf32> to vector<8x10xf32>
    %125 = vector.extract_strided_slice %122 {offsets = [0, 20], sizes = [8, 10], strides = [1, 1]} : vector<8x40xf32> to vector<8x10xf32>
    %cst_32 = arith.constant 2.000000e+00 : f32
    %126 = vector.broadcast %cst_32 : f32 to vector<8x10xf32>
    %127 = arith.mulf %126, %125 : vector<8x10xf32>
    %cst_33 = arith.constant 1.000000e+00 : f32
    %128 = vector.broadcast %cst_33 : f32 to vector<8x10xf32>
    %129 = arith.subf %127, %128 : vector<8x10xf32>
    %130 = vector.extract_strided_slice %122 {offsets = [0, 30], sizes = [8, 10], strides = [1, 1]} : vector<8x40xf32> to vector<8x10xf32>
    %131 = arith.mulf %124, %112 : vector<8x10xf32>
    %132 = arith.mulf %123, %129 : vector<8x10xf32>
    %133 = arith.addf %131, %132 : vector<8x10xf32>
    %134 = math.tanh %133 : vector<8x10xf32>
    %135 = arith.mulf %130, %134 : vector<8x10xf32>
    %136 = vector.extract_strided_slice %7 {offsets = [48, 0], sizes = [8, 40], strides = [1, 1]} : vector<64x40xf32> to vector<8x40xf32>
    %cst_34 = arith.constant dense<0.000000e+00> : vector<8x40xf32>
    %137 = tpu.matmul %135, %0, %cst_34 {dimension_numbers = #tpu.dot_dimension_numbers<[1], [0], [0], [1], [0, 0, 1, 1], [], []>} : vector<8x10xf32>, vector<10x40xf32>, vector<8x40xf32> -> vector<8x40xf32>
    %138 = arith.addf %136, %137 : vector<8x40xf32>
    %139 = arith.negf %138 : vector<8x40xf32>
    %140 = math.exp %139 : vector<8x40xf32>
    %cst_35 = arith.constant 1.000000e+00 : f32
    %141 = vector.broadcast %cst_35 : f32 to vector<8x40xf32>
    %142 = arith.addf %141, %140 : vector<8x40xf32>
    %143 = arith.divf %141, %142 : vector<8x40xf32>
    %144 = vector.extract_strided_slice %143 {offsets = [0, 0], sizes = [8, 10], strides = [1, 1]} : vector<8x40xf32> to vector<8x10xf32>
    %145 = vector.extract_strided_slice %143 {offsets = [0, 10], sizes = [8, 10], strides = [1, 1]} : vector<8x40xf32> to vector<8x10xf32>
    %146 = vector.extract_strided_slice %143 {offsets = [0, 20], sizes = [8, 10], strides = [1, 1]} : vector<8x40xf32> to vector<8x10xf32>
    %cst_36 = arith.constant 2.000000e+00 : f32
    %147 = vector.broadcast %cst_36 : f32 to vector<8x10xf32>
    %148 = arith.mulf %147, %146 : vector<8x10xf32>
    %cst_37 = arith.constant 1.000000e+00 : f32
    %149 = vector.broadcast %cst_37 : f32 to vector<8x10xf32>
    %150 = arith.subf %148, %149 : vector<8x10xf32>
    %151 = vector.extract_strided_slice %143 {offsets = [0, 30], sizes = [8, 10], strides = [1, 1]} : vector<8x40xf32> to vector<8x10xf32>
    %152 = arith.mulf %145, %133 : vector<8x10xf32>
    %153 = arith.mulf %144, %150 : vector<8x10xf32>
    %154 = arith.addf %152, %153 : vector<8x10xf32>
    %155 = math.tanh %154 : vector<8x10xf32>
    %156 = arith.mulf %151, %155 : vector<8x10xf32>
    %157 = vector.extract_strided_slice %7 {offsets = [56, 0], sizes = [8, 40], strides = [1, 1]} : vector<64x40xf32> to vector<8x40xf32>
    %cst_38 = arith.constant dense<0.000000e+00> : vector<8x40xf32>
    %158 = tpu.matmul %156, %0, %cst_38 {dimension_numbers = #tpu.dot_dimension_numbers<[1], [0], [0], [1], [0, 0, 1, 1], [], []>} : vector<8x10xf32>, vector<10x40xf32>, vector<8x40xf32> -> vector<8x40xf32>
    %159 = arith.addf %157, %158 : vector<8x40xf32>
    %160 = arith.negf %159 : vector<8x40xf32>
    %161 = math.exp %160 : vector<8x40xf32>
    %cst_39 = arith.constant 1.000000e+00 : f32
    %162 = vector.broadcast %cst_39 : f32 to vector<8x40xf32>
    %163 = arith.addf %162, %161 : vector<8x40xf32>
    %164 = arith.divf %162, %163 : vector<8x40xf32>
    %165 = vector.extract_strided_slice %164 {offsets = [0, 0], sizes = [8, 10], strides = [1, 1]} : vector<8x40xf32> to vector<8x10xf32>
    %166 = vector.extract_strided_slice %164 {offsets = [0, 10], sizes = [8, 10], strides = [1, 1]} : vector<8x40xf32> to vector<8x10xf32>
    %167 = vector.extract_strided_slice %164 {offsets = [0, 20], sizes = [8, 10], strides = [1, 1]} : vector<8x40xf32> to vector<8x10xf32>
    %cst_40 = arith.constant 2.000000e+00 : f32
    %168 = vector.broadcast %cst_40 : f32 to vector<8x10xf32>
    %169 = arith.mulf %168, %167 : vector<8x10xf32>
    %cst_41 = arith.constant 1.000000e+00 : f32
    %170 = vector.broadcast %cst_41 : f32 to vector<8x10xf32>
    %171 = arith.subf %169, %170 : vector<8x10xf32>
    %172 = vector.extract_strided_slice %164 {offsets = [0, 30], sizes = [8, 10], strides = [1, 1]} : vector<8x40xf32> to vector<8x10xf32>
    %173 = arith.mulf %166, %154 : vector<8x10xf32>
    %174 = arith.mulf %165, %171 : vector<8x10xf32>
    %175 = arith.addf %173, %174 : vector<8x10xf32>
    %176 = math.tanh %175 : vector<8x10xf32>
    %177 = arith.mulf %172, %176 : vector<8x10xf32>
    %c0_42 = arith.constant 0 : index
    %c0_43 = arith.constant 0 : index
    %178 = vector.load %arg7[%c0_42, %c0_43] : memref<8x10xf32, #tpu.memory_space<vmem>>, vector<8x10xf32>
    tpu.vector_store %arg7[%c0_42, %c0_43], %175 {strides = array<i32>} : memref<8x10xf32, #tpu.memory_space<vmem>>, vector<8x10xf32>,
    %179 = tpu.concatenate %30, %51, %72, %93, %114, %135, %156, %177 in 0 : vector<8x10xf32>, vector<8x10xf32>, vector<8x10xf32>, vector<8x10xf32>, vector<8x10xf32>, vector<8x10xf32>, vector<8x10xf32>, vector<8x10xf32> -> vector<64x10xf32>
    %c0_44 = arith.constant 0 : index
    %c0_45 = arith.constant 0 : index
    %180 = vector.load %arg4[%c0_44, %c0_45] : memref<10x4xf32, #tpu.memory_space<vmem>>, vector<10x4xf32>
    %cst_46 = arith.constant dense<0.000000e+00> : vector<64x4xf32>
    %181 = tpu.matmul %179, %180, %cst_46 {dimension_numbers = #tpu.dot_dimension_numbers<[1], [0], [0], [1], [0, 0, 1, 1], [], []>} : vector<64x10xf32>, vector<10x4xf32>, vector<64x4xf32> -> vector<64x4xf32>
    %c0_47 = arith.constant 0 : index
    %c0_48 = arith.constant 0 : index
    %182 = vector.load %arg5[%c0_47, %c0_48] : memref<1x4xf32, #tpu.memory_space<vmem>>, vector<1x4xf32>
    %183 = vector.broadcast %182 : vector<1x4xf32> to vector<64x4xf32>
    %184 = arith.addf %181, %183 : vector<64x4xf32>
    %185 = vector.shape_cast %184 : vector<64x4xf32> to vector<8x8x4xf32>
    %186 = tpu.transpose %185, [1, 0, 2] : vector<8x8x4xf32> -> vector<8x8x4xf32>
    %c0_49 = arith.constant 0 : index
    %c0_50 = arith.constant 0 : index
    %c0_51 = arith.constant 0 : index
    %187 = vector.load %arg6[%c0_49, %c0_50, %c0_51] : memref<8x8x4xf32, #tpu.memory_space<vmem>>, vector<8x8x4xf32>
    tpu.vector_store %arg6[%c0_49, %c0_50, %c0_51], %186 {strides = array<i32>} : memref<8x8x4xf32, #tpu.memory_space<vmem>>, vector<8x8x4xf32>,
    return
  }
}

</mosaic_0001>

<bundles_post_ra>
// kernel: trajectory_lstm_forward.1
= control target key start
LH: loop header
LB: loop body
LE: loop exit
PB: predicated region body
PF: predicated region fallthrough
CT: control target
= control target key end

     0   :  { %vm68_vm0 = vcmask 1043456   ;;  %vm43_vm1 = vcmask 31744   ;;  %vm181_vm2 = vcmask 1041408   ;;  %vm1546_vm3 = vmmov 1   ;;  %s1551_s19 = smov 10   ;;  %s1552_s20 = smov 20   ;;  %s1896_s1 = inlined_call_operand.vmem [shape: f32[4,40], index: 1, kind: input, shape index: {}]   ;;  %s1897_s0 = inlined_call_operand.vmem [shape: f32[8,8,4], index: 0, kind: input, shape index: {}]   ;;  %s1898_s2 = inlined_call_operand.vmem [shape: f32[10,40], index: 2, kind: input, shape index: {}]   ;;  %s1899_s3 = inlined_call_operand.vmem [shape: f32[1,40], index: 3, kind: input, shape index: {}]   ;;  %s1900_s4 = inlined_call_operand.vmem [shape: f32[10,4], index: 4, kind: input, shape index: {}]   ;;  %s1901_s5 = inlined_call_operand.vmem [shape: f32[1,4], index: 5, kind: input, shape index: {}]   ;;  %s1902_s7 = inlined_call_operand.vmem [shape: f32[8,10], index: 7, kind: output, shape index: {1}]   ;;  %s1903_s6 = inlined_call_operand.vmem [shape: f32[8,8,4], index: 6, kind: output, shape index: {0}]  }
   0x1   :  { %v35_v0 = vld [vmem:[%s1896_s1] sm:$0xf]  ;;  %v32_v2 = vld [vmem:[%s1897_s0 + $0x28] sm:$0xff]  ;;  %vm1614_vm4 = vmpackc.low %vm181_vm2, %vm1546_vm3  ;;  %v1547_v9 = vmov 0.0|0.0   ;;  %vm1548_vm5 = vmmov 0   ;;  %v1549_v12 = vmov 0.0  }
   0x2   :  { %v31_v1 = vld [vmem:[%s1897_s0 + $0x20] sm:$0xff]  ;;  %1485 = vmatprep.subr.msk.mxu1 %vm68_vm0, %v35_v0  ;;  %v26_v4 = vld [vmem:[%s1898_s2 + $0x8] sm:$0x3]  ;;  %1361 = vmatprep.subr.msk.mxu0 %vm68_vm0, %v35_v0  ;;  %v33_v7 = vld [vmem:[%s1897_s0 + $0x30] sm:$0xff]  ;;  %s1553_s21 = smov 98   ;;  %vm177_vm6 = vcmask 80896  }
   0x3   :  { %1369 = vmatprep.mubr.msk.f32.mxu1 %vm43_vm1, %v31_v1  ;;  %v25_v3 = vld [vmem:[%s1898_s2] sm:$0xff]  ;;  %1486 = vmatpush3.msk.msra.mxu1 %vm68_vm0, %v35_v0  ;;  %v28_v10 = vld [vmem:[%s1897_s0 + $0x8] sm:$0xff]  ;;  %v34_v11 = vld [vmem:[%s1897_s0 + $0x38] sm:$0xff] }
   0x4   :  { %v1619_v6 = vpack.c.bf16 %v26_v4, %v25_v3  ;;  %v27_v8 = vld [vmem:[%s1897_s0] sm:$0xff]  ;;  %1370 = vmatmul.mubr.msk.f32.vlgmr.msra.gmra.mrb[0].mxu1 %vm43_vm1, %v32_v2  ;;  %1447 = vmatprep.subr.bf16.mxu1 %v1547_v9  ;;  %v29_v54 = vld [vmem:[%s1897_s0 + $0x10] sm:$0xff]  ;;  %v30_v55 = vld [vmem:[%s1897_s0 + $0x18] sm:$0xff] }
   0x5   :  { %1372 = vmatprep.mubr.msk.f32.mxu1 %vm43_vm1, %v33_v7  ;;  %1362 = vmatpush3.msk.msra.mxu0 %vm68_vm0, %v35_v0  ;;  %v1666_v16 = vld [vmem:[%s1899_s3] ss:$0 sm:$0xff]  ;;  %s1550_s3 = smov 108  }
   0x6   :  { %1450 = vmatpush3.bf16.msk.msra.mxu1 %vm1614_vm4, %v1619_v6  ;;  %1363 = vmatprep.mubr.msk.f32.mxu0 %vm43_vm1, %v27_v8 }
   0x7   :  { %1364 = vmatmul.mubr.msk.f32.vlgmr.msra.gmra.mrb[0].mxu0 %vm43_vm1, %v28_v10  ;;  %1451 = vmatprep.subr.bf16.mxu1 %v1547_v9 }
   0x8   :  { %1373 = vmatmul.mubr.msk.f32.gmra.mrb[2].mxu1 %vm43_vm1, %v34_v11  ;;  %1463 = vmatprep.subr.bf16.mxu0 %v1547_v9 }
   0x9   :  { %1379 = vmatprep.mubr.msk.f32.mxu1 %vm1548_vm5, %v1549_v12  ;;  %1466 = vmatpush3.bf16.msk.msra.mxu0 %vm1614_vm4, %v1619_v6 }
   0xa   :  { %1471 = vmatprep.subr.bf16.mxu0 %v1547_v9  ;;  %1366 = vmatprep.mubr.msk.f32.mxu0 %vm43_vm1, %v29_v54 }
   0xb   :  { %1367 = vmatmul.mubr.msk.f32.gmra.mrb[2].mxu0 %vm43_vm1, %v30_v55 }
   0xc   :  { %1380 = vmatmul.mubr.f32.vlgmr.msra.gmra.mrb[4].mxu1 %v1549_v12  ;;  %1407 = vmatprep.mubr.msk.f32.mxu0 %vm1548_vm5, %v1549_v12 }
   0xd   :  { %1454 = vmatpush3.bf16.msk.msra.mxu1 %vm1614_vm4, %v1619_v6  ;;  %1386 = vmatprep.mubr.msk.f32.mxu1 %vm1548_vm5, %v1549_v12 }
   0xe   :  { %1455 = vmatprep.subr.bf16.mxu1 %v1547_v9 }
  0xd7   :  { %v1659_v13 = vpop.f32.mrb[0].mxu1 }
  0xd8   :  { %v1661_v14 = vpop.f32.mrb[1].mxu1 }
  0xda   :  { %v1365_v15 = vpop.f32.mrb[0].mxu0 }
  0xdb   :  { %v1668_v17 = vpop.f32.mrb[2].mxu1  ;;  %v138_v18 = vpop.f32.mrb[1].mxu0  ;;  %v144_v39 = vadd.f32 %v1365_v15, %v1666_v16 }
  0xdc   :  { %v1670_v19 = vpop.f32.mrb[3].mxu1  ;;  %v139_v20 = vadd.f32 %v1666_v16, %v138_v18 }
  0xdd   :  { %v169_v5 = vadd.f32 %v1666_v16, %v1670_v19 }
  0xde   :  { %v1368_v59 = vpop.f32.mrb[2].mxu0 }
  0xdf   :  { %v251_v21 = vpop.f32.mrb[4].mxu1  ;;  %v148_v60 = vpop.f32.mrb[3].mxu0 }
  0xe0   :  { %v255_v22 = vadd.f32 %v251_v21, %v139_v20  ;;  %v1381_v23 = vpop.f32.mrb[5].mxu1  ;;  %v149_v62 = vadd.f32 %v1666_v16, %v148_v60 }
  0xe2   :  { %v1278_v24 = vmul.f32 -1.442695, %v255_v22 }
  0xe4   :  { %1498 = vpow2.f32 %v1278_v24 }
  0xee   :  { %v1499_v25 = vpop.eup %1498 }
  0xef   :  { %v259_v26 = vadd.f32 1.0, %v1499_v25 }
  0xf1   :  { %1500 = vrcp.f32 %v259_v26  ;;  %v154_v26 = vadd.f32 %v1368_v59, %v1666_v16 }
  0xfb   :  { %v1501_v27 = vpop.eup %1500 }
  0xfc   :  { %v262_v28 = vmul.f32 2.0, %v1501_v27  ;;  %v264_v32 = vmul.f32 0.0, %v1501_v27 }
  0xfe   :  { %v1279_v29 = vadd.f32 -1.0, %v262_v28 }
 0x100   :  { %266 = vrot.lane.b32.xlu0 %v1279_v29, %s1550_s3 }
 0x172   :  { %v267_v30 = vpop.permute.xlu0 %266 }
 0x173   :  { %v269_v31 = vmul.f32 %v1501_v27, %v267_v30 }
 0x175   :  { %271 = vrot.lane.b32.xlu0 %v269_v31, %s1551_s19 }
 0x1e7   :  { %v272_v33 = vpop.permute.xlu0 %271 }
 0x1e8   :  { %v274_v34 = vadd.f32 %v272_v33, %v264_v32 }
 0x1ea   :  { %1502 = vtanh.f32 %v274_v34 }
 0x1f4   :  { %v1503_v35 = vpop.eup %1502 }
 0x1f5   :  { %277 = vrot.lane.b32.xlu1 %v1503_v35, %s1552_s20 }
 0x267   :  { %v278_v36 = vpop.permute.xlu1 %277 }
 0x268   :  { %v280_v37 = vmul.f32 %v1501_v27, %v278_v36 }
 0x26a   :  { %282 = vrot.lane.b32.xlu1 %v280_v37, %s1553_s21 }
 0x2dc   :  { %v1677_v38 = vpop.permute.xlu1 %282 }
 0x2dd   :  { %1387 = vmatmul.mubr.msk.f32.vlgmr.msra.gmra.mrb[6].mxu1 %vm177_vm6, %v1677_v38 }
 0x2de   :  { %1458 = vmatpush3.bf16.msk.msra.mxu1 %vm1614_vm4, %v1619_v6  ;;  %1393 = vmatprep.mubr.msk.f32.mxu1 %vm1548_vm5, %v1549_v12 }
 0x2df   :  { %1459 = vmatprep.subr.bf16.mxu1 %v1547_v9 }
 0x3b0   :  { %v352_v40 = vpop.f32.mrb[6].mxu1 }
 0x3b1   :  { %v356_v41 = vadd.f32 %v352_v40, %v144_v39  ;;  %v1388_v42 = vpop.f32.mrb[7].mxu1 }
 0x3b3   :  { %v1282_v43 = vmul.f32 -1.442695, %v356_v41 }
 0x3b5   :  { %1504 = vpow2.f32 %v1282_v43 }
 0x3bf   :  { %v1505_v44 = vpop.eup %1504 }
 0x3c0   :  { %v360_v45 = vadd.f32 1.0, %v1505_v44 }
 0x3c2   :  { %1506 = vrcp.f32 %v360_v45  ;;  %v159_v45 = vadd.f32 %v1666_v16, %v1661_v14 }
 0x3cc   :  { %v1507_v46 = vpop.eup %1506 }
 0x3cd   :  { %v363_v47 = vmul.f32 2.0, %v1507_v46  ;;  %v365_v51 = vmul.f32 %v1507_v46, %v274_v34 }
 0x3cf   :  { %v1283_v48 = vadd.f32 -1.0, %v363_v47 }
 0x3d1   :  { %367 = vrot.lane.b32.xlu0 %v1283_v48, %s1550_s3 }
 0x443   :  { %v368_v49 = vpop.permute.xlu0 %367 }
 0x444   :  { %v370_v50 = vmul.f32 %v1507_v46, %v368_v49 }
 0x446   :  { %372 = vrot.lane.b32.xlu1 %v370_v50, %s1551_s19 }
 0x4b8   :  { %v373_v52 = vpop.permute.xlu1 %372 }
 0x4b9   :  { %v375_v53 = vadd.f32 %v373_v52, %v365_v51 }
 0x4bb   :  { %1508 = vtanh.f32 %v375_v53 }
 0x4c5   :  { %v1509_v56 = vpop.eup %1508 }
 0x4c6   :  { %378 = vrot.lane.b32.xlu0 %v1509_v56, %s1552_s20 }
 0x538   :  { %v379_v57 = vpop.permute.xlu0 %378 }
 0x539   :  { %v381_v58 = vmul.f32 %v1507_v46, %v379_v57 }
 0x53b   :  { %383 = vrot.lane.b32.xlu1 %v381_v58, %s1553_s21 }
 0x5ad   :  { %v1702_v61 = vpop.permute.xlu1 %383 }
 0x5ae   :  { %1394 = vmatmul.mubr.msk.f32.vlgmr.msra.gmra.mrb[8].mxu1 %vm177_vm6, %v1702_v61 }
 0x5af   :  { %1462 = vmatpush3.bf16.msk.msra.mxu1 %vm1614_vm4, %v1619_v6  ;;  %1400 = vmatprep.mubr.msk.f32.mxu1 %vm1548_vm5, %v1549_v12 }
 0x5b0   :  { %1467 = vmatprep.subr.bf16.mxu1 %v1547_v9 }
 0x681   :  { %v453_v63 = vpop.f32.mrb[8].mxu1 }
 0x682   :  { %v457_v0 = vadd.f32 %v453_v63, %v149_v62  ;;  %v1395_v1 = vpop.f32.mrb[9].mxu1 }
 0x684   :  { %v1286_v2 = vmul.f32 -1.442695, %v457_v0  ;;  %v164_v0 = vadd.f32 %v1659_v13, %v1666_v16 }
 0x686   :  { %1510 = vpow2.f32 %v1286_v2 }
 0x690   :  { %v1511_v3 = vpop.eup %1510 }
 0x691   :  { %v461_v4 = vadd.f32 1.0, %v1511_v3 }
 0x693   :  { %1512 = vrcp.f32 %v461_v4 }
 0x69d   :  { %v1513_v7 = vpop.eup %1512 }
 0x69e   :  { %v464_v8 = vmul.f32 2.0, %v1513_v7  ;;  %v466_v18 = vmul.f32 %v1513_v7, %v375_v53 }
 0x6a0   :  { %v1287_v10 = vadd.f32 -1.0, %v464_v8 }
 0x6a2   :  { %468 = vrot.lane.b32.xlu0 %v1287_v10, %s1550_s3 }
 0x714   :  { %v469_v11 = vpop.permute.xlu0 %468 }
 0x715   :  { %v471_v15 = vmul.f32 %v1513_v7, %v469_v11 }
 0x717   :  { %473 = vrot.lane.b32.xlu1 %v471_v15, %s1551_s19 }
 0x789   :  { %v474_v20 = vpop.permute.xlu1 %473 }
 0x78a   :  { %v476_v21 = vadd.f32 %v474_v20, %v466_v18 }
 0x78c   :  { %1514 = vtanh.f32 %v476_v21 }
 0x796   :  { %v1515_v22 = vpop.eup %1514 }
 0x797   :  { %479 = vrot.lane.b32.xlu0 %v1515_v22, %s1552_s20  ;;  %v993_v22 = vld [vmem:[%s1900_s4] sm:$0xff] }
 0x809   :  { %v480_v23 = vpop.permute.xlu0 %479 }
 0x80a   :  { %v482_v24 = vmul.f32 %v1513_v7, %v480_v23  ;;  %v994_v23 = vld [vmem:[%s1900_s4 + $0x8] sm:$0x3] }
 0x80c   :  { %484 = vrot.lane.b32.xlu1 %v482_v24, %s1553_s21  ;;  %v1479_v24 = vpack.c.bf16 %v994_v23, %v993_v22 }
 0x87e   :  { %v1717_v25 = vpop.permute.xlu1 %484 }
 0x87f   :  { %1401 = vmatmul.mubr.msk.f32.vlgmr.msra.gmra.mrb[10].mxu1 %vm177_vm6, %v1717_v25 }
 0x880   :  { %1470 = vmatpush3.bf16.msk.msra.mxu1 %vm1614_vm4, %v1619_v6  ;;  %1414 = vmatprep.mubr.msk.f32.mxu1 %vm1548_vm5, %v1549_v12 }
 0x881   :  { %1475 = vmatprep.subr.bf16.mxu1 %v1547_v9 }
 0x952   :  { %v554_v27 = vpop.f32.mrb[10].mxu1 }
 0x953   :  { %v558_v28 = vadd.f32 %v554_v27, %v154_v26  ;;  %v1402_v29 = vpop.f32.mrb[11].mxu1 }
 0x955   :  { %v1290_v30 = vmul.f32 -1.442695, %v558_v28 }
 0x957   :  { %1516 = vpow2.f32 %v1290_v30 }
 0x961   :  { %v1517_v31 = vpop.eup %1516 }
 0x962   :  { %v562_v32 = vadd.f32 1.0, %v1517_v31 }
 0x964   :  { %1518 = vrcp.f32 %v562_v32 }
 0x96e   :  { %v1519_v33 = vpop.eup %1518 }
 0x96f   :  { %v565_v34 = vmul.f32 2.0, %v1519_v33  ;;  %v567_v9 = vmul.f32 %v1519_v33, %v476_v21 }
 0x971   :  { %v1291_v35 = vadd.f32 -1.0, %v565_v34 }
 0x973   :  { %569 = vrot.lane.b32.xlu0 %v1291_v35, %s1550_s3 }
 0x9e5   :  { %v570_v36 = vpop.permute.xlu0 %569 }
 0x9e6   :  { %v572_v37 = vmul.f32 %v1519_v33, %v570_v36 }
 0x9e8   :  { %574 = vrot.lane.b32.xlu1 %v572_v37, %s1551_s19  ;;  %v1790_v37 = vld [vmem:[%s1901_s5] ss:$0 sm:$0xff]  ;;  %s1555_s5 = smov 118  }
 0xa5a   :  { %v575_v39 = vpop.permute.xlu1 %574 }
 0xa5b   :  { %v577_v40 = vadd.f32 %v575_v39, %v567_v9 }
 0xa5d   :  { %1520 = vtanh.f32 %v577_v40 }
 0xa67   :  { %v1521_v41 = vpop.eup %1520 }
 0xa68   :  { %580 = vrot.lane.b32.xlu0 %v1521_v41, %s1552_s20 }
 0xada   :  { %v581_v42 = vpop.permute.xlu0 %580 }
 0xadb   :  { %v583_v43 = vmul.f32 %v1519_v33, %v581_v42  ;;  %v1120_v33 = vlaneseq }
 0xadd   :  { %585 = vrot.lane.b32.xlu1 %v583_v43, %s1553_s21  ;;  %v1785_v36 = vshrl.u32 %v1120_v33, 7 }
 0xb4f   :  { %v1732_v44 = vpop.permute.xlu1 %585 }
 0xb50   :  { %1408 = vmatmul.mubr.msk.f32.vlgmr.msra.gmra.mrb[4].mxu0 %vm177_vm6, %v1732_v44 }
 0xb51   :  { %1474 = vmatpush3.bf16.msk.msra.mxu0 %vm1614_vm4, %v1619_v6  ;;  %1421 = vmatprep.mubr.msk.f32.mxu0 %vm1548_vm5, %v1549_v12 }
 0xb52   :  { %1481 = vmatprep.subr.msk.bf16.mxu0 %vm1614_vm4, %v1479_v24 }
 0xc23   :  { %v655_v46 = vpop.f32.mrb[4].mxu0 }
 0xc24   :  { %v659_v47 = vadd.f32 %v655_v46, %v159_v45  ;;  %v1409_v48 = vpop.f32.mrb[5].mxu0 }
 0xc26   :  { %v1294_v49 = vmul.f32 -1.442695, %v659_v47 }
 0xc28   :  { %1522 = vpow2.f32 %v1294_v49 }
 0xc32   :  { %v1523_v50 = vpop.eup %1522 }
 0xc33   :  { %v663_v51 = vadd.f32 1.0, %v1523_v50 }
 0xc35   :  { %1524 = vrcp.f32 %v663_v51 }
 0xc3f   :  { %v1525_v52 = vpop.eup %1524 }
 0xc40   :  { %v666_v53 = vmul.f32 2.0, %v1525_v52  ;;  %v668_v57 = vmul.f32 %v1525_v52, %v577_v40 }
 0xc42   :  { %v1295_v54 = vadd.f32 -1.0, %v666_v53 }
 0xc44   :  { %670 = vrot.lane.b32.xlu0 %v1295_v54, %s1550_s3 }
 0xcb6   :  { %v671_v55 = vpop.permute.xlu0 %670 }
 0xcb7   :  { %v673_v56 = vmul.f32 %v1525_v52, %v671_v55 }
 0xcb9   :  { %675 = vrot.lane.b32.xlu1 %v673_v56, %s1551_s19 }
 0xd2b   :  { %v676_v58 = vpop.permute.xlu1 %675 }
 0xd2c   :  { %v678_v14 = vadd.f32 %v676_v58, %v668_v57 }
 0xd2e   :  { %1526 = vtanh.f32 %v678_v14 }
 0xd38   :  { %v1527_v59 = vpop.eup %1526 }
 0xd39   :  { %681 = vrot.lane.b32.xlu0 %v1527_v59, %s1552_s20 }
 0xdab   :  { %v682_v60 = vpop.permute.xlu0 %681 }
 0xdac   :  { %v684_v62 = vmul.f32 %v1525_v52, %v682_v60 }
 0xdae   :  { %686 = vrot.lane.b32.xlu1 %v684_v62, %s1553_s21 }
 0xe20   :  { %v687_v63 = vpop.permute.xlu1 %686 }
 0xe21   :  { %1415 = vmatmul.mubr.msk.f32.vlgmr.msra.gmra.mrb[12].mxu1 %vm177_vm6, %v687_v63 }
 0xe22   :  { %1478 = vmatpush3.bf16.msk.msra.mxu1 %vm1614_vm4, %v1619_v6  ;;  %1428 = vmatprep.mubr.msk.f32.mxu1 %vm1548_vm5, %v1549_v12 }
 0xef4   :  { %v756_v1 = vpop.f32.mrb[12].mxu1 }
 0xef5   :  { %v760_v2 = vadd.f32 %v756_v1, %v164_v0  ;;  %v1416_v3 = vpop.f32.mrb[13].mxu1 }
 0xef7   :  { %v1298_v4 = vmul.f32 -1.442695, %v760_v2 }
 0xef9   :  { %1528 = vpow2.f32 %v1298_v4 }
 0xf03   :  { %v1529_v7 = vpop.eup %1528 }
 0xf04   :  { %v764_v8 = vadd.f32 1.0, %v1529_v7 }
 0xf06   :  { %1530 = vrcp.f32 %v764_v8 }
 0xf10   :  { %v1531_v10 = vpop.eup %1530 }
 0xf11   :  { %v767_v11 = vmul.f32 2.0, %v1531_v10  ;;  %v769_v12 = vmul.f32 %v1531_v10, %v678_v14 }
 0xf13   :  { %v1299_v15 = vadd.f32 -1.0, %v767_v11  ;;  %v174_v11 = vadd.f32 %v1668_v17, %v1666_v16 }
 0xf15   :  { %771 = vrot.lane.b32.xlu0 %v1299_v15, %s1550_s3 }
 0xf87   :  { %v772_v6 = vpop.permute.xlu0 %771 }
 0xf88   :  { %v774_v18 = vmul.f32 %v1531_v10, %v772_v6 }
 0xf8a   :  { %776 = vrot.lane.b32.xlu1 %v774_v18, %s1551_s19 }
 0xffc   :  { %v777_v20 = vpop.permute.xlu1 %776 }
 0xffd   :  { %v1757_v13 = vadd.f32 %v777_v20, %v769_v12 }
 0xfff   :  { %1532 = vtanh.f32 %v1757_v13 }
0x1009   :  { %v1533_v21 = vpop.eup %1532 }
0x100a   :  { %782 = vrot.lane.b32.xlu0 %v1533_v21, %s1552_s20 }
0x107c   :  { %v783_v26 = vpop.permute.xlu0 %782 }
0x107d   :  { %v785_v27 = vmul.f32 %v1531_v10, %v783_v26 }
0x107f   :  { %787 = vrot.lane.b32.xlu1 %v785_v27, %s1553_s21 }
0x10f1   :  { %v788_v28 = vpop.permute.xlu1 %787 }
0x10f2   :  { %1422 = vmatmul.mubr.msk.f32.vlgmr.msra.gmra.mrb[6].mxu0 %vm177_vm6, %v788_v28 }
0x10f3   :  { %1484 = vmatpush3.bf16.msk.msra.mxu0 %vm1614_vm4, %v1479_v24  ;;  %1435 = vmatprep.mubr.msk.f32.mxu0 %vm177_vm6, %v1677_v38  ;;  %v1554_v38 = vmov 1983009808  }
0x10f4   :  { %v1118_v32 = vunpack.c.l.s4 %v1554_v38  ;;  %v1556_v38 = vmov 1934713408  }
0x10f6   :  { %1436 = vmatmul.mubr.msk.f32.vlgmr.msra.gmra.mrb[8].mxu0 %vm177_vm6, %v1702_v61  ;;  %v1119_v35 = vunpack.c.0.s8 %v1118_v32  ;;  %v1182_v32 = vunpack.c.l.s4 %v1556_v38 }
0x10f7   :  { %1438 = vmatprep.mubr.msk.f32.mxu0 %vm177_vm6, %v1717_v25 }
0x10f8   :  { %v1795_v40 = vsub.s32 %v1119_v35, %v1785_v36 }
0x10fa   :  { %1439 = vmatmul.mubr.msk.f32.gmra.mrb[10].mxu0 %vm177_vm6, %v1732_v44 }
0x10fb   :  { %1441 = vmatprep.mubr.msk.f32.mxu0 %vm177_vm6, %v687_v63 }
0x10fe   :  { %1442 = vmatmul.mubr.msk.f32.gmra.mrb[12].mxu0 %vm177_vm6, %v788_v28 }
0x11c5   :  { %v857_v29 = vpop.f32.mrb[6].mxu0 }
0x11c6   :  { %v861_v30 = vadd.f32 %v857_v29, %v169_v5  ;;  %v1423_v31 = vpop.f32.mrb[7].mxu0 }
0x11c8   :  { %v1302_v61 = vmul.f32 -1.442695, %v861_v30 }
0x11c9   :  { %v1437_v34 = vpop.f32.mrb[8].mxu0 }
0x11ca   :  { %1534 = vpow2.f32 %v1302_v61  ;;  %v1076_v25 = vpop.f32.mrb[9].mxu0  ;;  %v1082_v19 = vadd.f32 %v1437_v34, %v1790_v37  ;;  %v1183_v61 = vunpack.c.0.s8 %v1182_v32 }
0x11cb   :  { %v1077_v42 = vadd.f32 %v1790_v37, %v1076_v25 }
0x11cd   :  { %v1440_v9 = vpop.f32.mrb[10].mxu0 }
0x11ce   :  { %v1092_v39 = vadd.f32 %v1440_v9, %v1790_v37  ;;  %v1086_v41 = vpop.f32.mrb[11].mxu0 }
0x11cf   :  { %v1087_v43 = vadd.f32 %v1790_v37, %v1086_v41 }
0x11d0   :  { %v1131_v44 = vcombine.low %v1082_v19, %v1092_v39  ;;  %v1132_v45 = vcombine.high %v1082_v19, %v1092_v39 }
0x11d1   :  { %v1115_v46 = vcombine.low %v1077_v42, %v1087_v43  ;;  %v1116_v47 = vcombine.high %v1077_v42, %v1087_v43  ;;  %v1799_v48 = vpop.f32.mrb[12].mxu0 }
0x11d2   :  { %v1802_v49 = vrot.slane %v1131_v44, %v1795_v40  ;;  %v1805_v50 = vrot.slane %v1132_v45, %v1795_v40  ;;  %v1807_v51 = vpop.f32.mrb[13].mxu0  ;;  %v1102_v34 = vadd.f32 %v1799_v48, %v1790_v37  ;;  %v1186_v44 = vsub.s32 %v1183_v61, %v1785_v36 }
0x11d3   :  { %v1810_v52 = vrot.slane %v1115_v46, %v1795_v40  ;;  %v1813_v53 = vrot.slane %v1116_v47, %v1795_v40  ;;  %v1097_v9 = vadd.f32 %v1790_v37, %v1807_v51 }
0x11d4   :  { %v1535_v54 = vpop.eup %1534 }
0x11d5   :  { %v865_v55 = vadd.f32 1.0, %v1535_v54  ;;  %v1179_v56 = vcombine.low %v1810_v52, %v1802_v49  ;;  %v1180_v57 = vcombine.high %v1810_v52, %v1802_v49  ;;  %v1195_v58 = vcombine.low %v1813_v53, %v1805_v50 }
0x11d6   :  { %v1196_v14 = vcombine.high %v1813_v53, %v1805_v50 }
0x11d7   :  { %1536 = vrcp.f32 %v865_v55  ;;  %v1194_v36 = vrot.slane %v1180_v57, %v1186_v44 }
0x11e1   :  { %v1537_v59 = vpop.eup %1536 }
0x11e2   :  { %v868_v60 = vmul.f32 2.0, %v1537_v59  ;;  %v870_v1 = vmul.f32 %v1537_v59, %v1757_v13 }
0x11e4   :  { %v1303_v62 = vadd.f32 -1.0, %v868_v60 }
0x11e6   :  { %872 = vrot.lane.b32.xlu0 %v1303_v62, %s1550_s3 }
0x1258   :  { %v873_v63 = vpop.permute.xlu0 %872 }
0x1259   :  { %v875_v0 = vmul.f32 %v1537_v59, %v873_v63 }
0x125b   :  { %877 = vrot.lane.b32.xlu1 %v875_v0, %s1551_s19 }
0x12cd   :  { %v878_v2 = vpop.permute.xlu1 %877 }
0x12ce   :  { %v880_v3 = vadd.f32 %v878_v2, %v870_v1  ;;  %v1210_v1 = vrot.slane %v1196_v14, %v1186_v44 }
0x12d0   :  { %1538 = vtanh.f32 %v880_v3 }
0x12da   :  { %v1539_v4 = vpop.eup %1538 }
0x12db   :  { %883 = vrot.lane.b32.xlu0 %v1539_v4, %s1552_s20 }
0x134d   :  { %v884_v7 = vpop.permute.xlu0 %883 }
0x134e   :  { %v886_v8 = vmul.f32 %v1537_v59, %v884_v7 }
0x1350   :  { %888 = vrot.lane.b32.xlu1 %v886_v8, %s1553_s21 }
0x13c2   :  { %v889_v10 = vpop.permute.xlu1 %888 }
0x13c3   :  { %1429 = vmatmul.mubr.msk.f32.vlgmr.msra.gmra.mrb[14].mxu1 %vm177_vm6, %v889_v10  ;;  %1444 = vmatprep.mubr.msk.f32.mxu0 %vm177_vm6, %v889_v10 }
0x1496   :  { %v958_v15 = vpop.f32.mrb[14].mxu1 }
0x1497   :  { %v962_v6 = vadd.f32 %v958_v15, %v174_v11  ;;  %v1430_v18 = vpop.f32.mrb[15].mxu1 }
0x1499   :  { %v1306_v12 = vmul.f32 -1.442695, %v962_v6 }
0x149b   :  { %1540 = vpow2.f32 %v1306_v12 }
0x14a5   :  { %v1541_v20 = vpop.eup %1540 }
0x14a6   :  { %v966_v13 = vadd.f32 1.0, %v1541_v20 }
0x14a8   :  { %1542 = vrcp.f32 %v966_v13 }
0x14b2   :  { %v1543_v21 = vpop.eup %1542 }
0x14b3   :  { %v969_v22 = vmul.f32 2.0, %v1543_v21  ;;  %v971_v27 = vmul.f32 %v1543_v21, %v880_v3 }
0x14b5   :  { %v1307_v23 = vadd.f32 -1.0, %v969_v22 }
0x14b7   :  { %973 = vrot.lane.b32.xlu0 %v1307_v23, %s1550_s3 }
0x1529   :  { %v974_v24 = vpop.permute.xlu0 %973 }
0x152a   :  { %v976_v26 = vmul.f32 %v1543_v21, %v974_v24 }
0x152c   :  { %978 = vrot.lane.b32.xlu1 %v976_v26, %s1551_s19 }
0x159e   :  { %v979_v28 = vpop.permute.xlu1 %978 }
0x159f   :  { %v981_v16 = vadd.f32 %v979_v28, %v971_v27 }
0x15a1   :  { %1544 = vtanh.f32 %v981_v16 }
0x15ab   :  { %v1545_v17 = vpop.eup %1544 }
0x15ac   :  { %984 = vrot.lane.b32.xlu0 %v1545_v17, %s1552_s20 }
0x15b0   :  { %989 = vrot.lane.b32.xlu0 %v981_v16, %s1555_s5 }
0x161e   :  { %v985_v5 = vpop.permute.xlu0 %984 }
0x161f   :  { %v987_v29 = vmul.f32 %v1543_v21, %v985_v5 }
0x1621   :  { %1003 = vrot.lane.b32.xlu1 %v987_v29, %s1553_s21 }
0x1622   :  { %v990_v30 = vpop.permute.xlu0 %989 }
0x1623   :  { %992 = vst.msk [vmem:[%s1902_s7] sm:$0xff] %vm177_vm6, %v990_v30 }
0x1693   :  { %v1004_v31 = vpop.permute.xlu1 %1003 }
0x1694   :  { %1445 = vmatmul.mubr.msk.f32.gmra.mrb[14].mxu0 %vm177_vm6, %v1004_v31 }
0x1767   :  { %v1446_v33 = vpop.f32.mrb[14].mxu0 }
0x1768   :  { %v1112_v25 = vadd.f32 %v1446_v33, %v1790_v37  ;;  %v1106_v35 = vpop.f32.mrb[15].mxu0 }
0x1769   :  { %v1107_v19 = vadd.f32 %v1790_v37, %v1106_v35  ;;  %v1187_v37 = vrot.slane %v1179_v56, %v1186_v44 }
0x176a   :  { %v1163_v39 = vcombine.low %v1102_v34, %v1112_v25  ;;  %v1164_v41 = vcombine.high %v1102_v34, %v1112_v25 }
0x176b   :  { %v1147_v42 = vcombine.low %v1097_v9, %v1107_v19  ;;  %v1148_v43 = vcombine.high %v1097_v9, %v1107_v19 }
0x176c   :  { %v1171_v45 = vrot.slane %v1163_v39, %v1795_v40  ;;  %v1178_v46 = vrot.slane %v1164_v41, %v1795_v40 }
0x176d   :  { %v1155_v47 = vrot.slane %v1147_v42, %v1795_v40  ;;  %v1162_v48 = vrot.slane %v1148_v43, %v1795_v40  ;;  %v1203_v40 = vrot.slane %v1195_v58, %v1186_v44 }
0x176f   :  { %v1211_v54 = vcombine.low %v1155_v47, %v1171_v45  ;;  %v1212_v55 = vcombine.high %v1155_v47, %v1171_v45  ;;  %v1227_v59 = vcombine.low %v1162_v48, %v1178_v46  ;;  %v1228_v51 = vcombine.high %v1162_v48, %v1178_v46 }
0x1771   :  { %v1219_v60 = vrot.slane %v1211_v54, %v1186_v44  ;;  %v1226_v62 = vrot.slane %v1212_v55, %v1186_v44  ;;  %v1235_v63 = vrot.slane %v1227_v59, %v1186_v44  ;;  %v1242_v0 = vrot.slane %v1228_v51, %v1186_v44 }
0x1773   :  { %v1243_v2 = vcombine.low %v1187_v37, %v1219_v60  ;;  %v1244_v3 = vcombine.high %v1187_v37, %v1219_v60  ;;  %v1245_v4 = vcombine.low %v1194_v36, %v1226_v62  ;;  %v1246_v56 = vcombine.high %v1194_v36, %v1226_v62 }
0x1774   :  { %v1247_v7 = vcombine.low %v1203_v40, %v1235_v63  ;;  %v1248_v8 = vcombine.high %v1203_v40, %v1235_v63  ;;  %v1249_v49 = vcombine.low %v1210_v1, %v1242_v0  ;;  %v1250_v52 = vcombine.high %v1210_v1, %v1242_v0 }
0x1775   :  { %1251 = vst.msk [vmem:[%s1903_s6] sm:$0xff] %vm43_vm1, %v1243_v2  ;;  %1252 = vst.msk [vmem:[%s1903_s6 + $0x8] sm:$0xff] %vm43_vm1, %v1244_v3 }
0x1776   :  { %1253 = vst.msk [vmem:[%s1903_s6 + $0x10] sm:$0xff] %vm43_vm1, %v1245_v4  ;;  %1254 = vst.msk [vmem:[%s1903_s6 + $0x18] sm:$0xff] %vm43_vm1, %v1246_v56 }
0x1777   :  { %1255 = vst.msk [vmem:[%s1903_s6 + $0x20] sm:$0xff] %vm43_vm1, %v1247_v7  ;;  %1256 = vst.msk [vmem:[%s1903_s6 + $0x28] sm:$0xff] %vm43_vm1, %v1248_v8 }
0x1778   :  { %1257 = vst.msk [vmem:[%s1903_s6 + $0x30] sm:$0xff] %vm43_vm1, %v1249_v49  ;;  %1258 = vst.msk [vmem:[%s1903_s6 + $0x38] sm:$0xff] %vm43_vm1, %v1250_v52 }

</bundles_post_ra>
